<compile_context>
chip_gen: v7x
topology: tpu7x:2x2x1
jax: 0.10.0
libtpu: 0.0.40
codegen_flags: <defaults>
</compile_context>

<pallas_src>
import functools

import jax
import jax.numpy as jnp
from jax.experimental import pallas as pl
from jax.experimental.pallas import tpu as pltpu


def _round_up(x, m):
    return -(-x // m) * m


def _vmem_capacity_bytes():
    try:
        cap = int(pltpu.get_tpu_info().vmem_capacity_bytes)
        if cap > 0:
            return cap
    except Exception:
        pass
    return 64 * 1024 * 1024          # conservative fallback (v7x-sized VMEM)


def dca_kernel(logits_ref, targets_ref, ce_out, conf_out, corr_out,
               acc_ce, acc_conf, acc_corr, *, n_total, tiles_per_core):
    p = pl.program_id(0)             # TensorCore-split axis ("parallel")
    i = pl.program_id(1)             # batch-tile axis ("arbitrary")
    g = p * tiles_per_core + i       # global tile index (phantom tiles clamped in index_map)

    @pl.when(i == 0)
    def _init():
        acc_ce[...] = jnp.zeros_like(acc_ce)
        acc_conf[...] = jnp.zeros_like(acc_conf)
        acc_corr[...] = jnp.zeros_like(acc_corr)

    x = logits_ref[...]              # [tn, C], native dtype (bf16 stays bf16 on the wire)
    t = targets_ref[...]             # [tn, 1], int32
    tn, c = x.shape

    # ---- per-row stats; compares/selects in native dtype (bf16 VPU on v6e/v7x) ----
    m = jnp.max(x, axis=1, keepdims=True)                       # [tn, 1]
    col = jax.lax.broadcasted_iota(jnp.int32, (tn, c), 1)       # class ids
    # argmax with first-max tie-break (matches jnp.argmax)
    pred = jnp.min(jnp.where(x == m, col, c), axis=1, keepdims=True)
    correct = (pred == t).astype(jnp.float32)                   # [tn, 1]
    # logits[i, t_i] via where-select (picks exactly one element per row -> exact)
    tgt_logit = jnp.sum(jnp.where(col == t, x, jnp.zeros_like(x)),
                        axis=1, keepdims=True).astype(jnp.float32)

    # ---- exp / log-sum-exp path in f32 ----
    xf = x.astype(jnp.float32)
    mf = m.astype(jnp.float32)
    ex = jnp.exp(xf - mf)                                       # [tn, C] (EUP)
    sum_ex = jnp.sum(ex, axis=1, keepdims=True)                 # [tn, 1] (XLU)
    lse = jnp.log(sum_ex) + mf
    conf = pl.reciprocal(sum_ex)     # max softmax prob = 1 / sum(exp(x - max))
    ce_rows = lse - tgt_logit        # per-row cross entropy

    # Masking is only needed on tiles that reach past the true batch size
    # (ragged tail / fully-phantom tiles of an uneven core split).
    needs_mask = (g + 1) * tn > n_total

    @pl.when(needs_mask)
    def _accumulate_masked():
        row = g * tn + jax.lax.broadcasted_iota(jnp.int32, (tn, 1), 0)
        valid = row < n_total
        zero = jnp.zeros_like(conf)
        acc_ce[...] += jnp.sum(jnp.where(valid, ce_rows, zero), axis=0, keepdims=True)
        acc_conf[...] += jnp.sum(jnp.where(valid, conf, zero), axis=0, keepdims=True)
        acc_corr[...] += jnp.sum(jnp.where(valid, correct, zero), axis=0, keepdims=True)

    @pl.when(jnp.logical_not(needs_mask))
    def _accumulate_full():
        acc_ce[...] += jnp.sum(ce_rows, axis=0, keepdims=True)
        acc_conf[...] += jnp.sum(conf, axis=0, keepdims=True)
        acc_corr[...] += jnp.sum(correct, axis=0, keepdims=True)

    @pl.when(i == pl.num_programs(1) - 1)
    def _finalize():
        ce_out[...] = acc_ce[...].reshape(1, 1, 1)
        conf_out[...] = acc_conf[...].reshape(1, 1, 1)
        corr_out[...] = acc_corr[...].reshape(1, 1, 1)


def dca_loss(logits, targets, beta=1.0, tile_n=None):
    n, c = logits.shape
    itemsize = jnp.dtype(logits.dtype).itemsize

    vmem_cap = _vmem_capacity_bytes()
    budget = min((vmem_cap * 3) // 5, 80 * 1024 * 1024)

    if tile_n is None:
        # VMEM bytes per batch row while a tile is live:
        #   2x double-buffered logits block + ~5 [tn,C] f32/i32 temporaries
        #   + double-buffered lane-padded (tn,1) targets + ~10 (tn,1) f32 columns
        per_row = 2 * c * itemsize + 20 * c + 2 * 512 + 10 * 512
        tile_n = budget // max(per_row, 1)
    tile_n = int(min(tile_n, 32768, _round_up(n, 8)))
    tile_n = max(8, (tile_n // 8) * 8)

    n_tiles = -(-n // tile_n)
    # Rebalance an odd tile count so the 2-core split doesn't leave one core a
    # fully-phantom tile (the phantom would still be correct, just wasted work).
    if n_tiles > 1 and n_tiles % 2 == 1:
        tile_n = max(8, _round_up(-(-n // (n_tiles + 1)), 8))
        n_tiles = -(-n // tile_n)
    n_cores = 2 if n_tiles > 1 else 1
    tiles_per_core = -(-n_tiles // n_cores)
    last_tile = n_tiles - 1

    t2 = targets.astype(jnp.int32).reshape(n, 1)

    def in_idx(p, i):
        # clamp phantom tiles of an uneven split to the last real tile; the
        # in-kernel row-validity mask zeroes their contribution.
        return (jnp.minimum(p * tiles_per_core + i, last_tile), 0)

    out_idx = lambda p, i: (p, 0, 0)
    out_sds = jax.ShapeDtypeStruct((n_cores, 1, 1), jnp.float32)
    out_spec = pl.BlockSpec((1, 1, 1), out_idx)

    grid_spec = pltpu.PrefetchScalarGridSpec(
        num_scalar_prefetch=0,
        grid=(n_cores, tiles_per_core),
        in_specs=[
            pl.BlockSpec((tile_n, c), in_idx),      # logits tile (native dtype)
            pl.BlockSpec((tile_n, 1), in_idx),      # targets tile
        ],
        out_specs=[out_spec, out_spec, out_spec],
        scratch_shapes=[pltpu.VMEM((1, 1), jnp.float32)] * 3,
    )

    cost = pl.CostEstimate(
        flops=12 * n * c,
        transcendentals=n * c + 2 * n,
        bytes_accessed=n * c * itemsize + n * 4 + 3 * n_cores * 4,
    )

    ce_sum, conf_sum, corr_sum = pl.pallas_call(
        functools.partial(dca_kernel, n_total=n, tiles_per_core=tiles_per_core),
        out_shape=(out_sds, out_sds, out_sds),
        grid_spec=grid_spec,
        compiler_params=pltpu.CompilerParams(
            dimension_semantics=("parallel", "arbitrary"),
            vmem_limit_bytes=int(min(vmem_cap, budget + 24 * 1024 * 1024)),
        ),
        cost_estimate=cost,
    )(logits, t2)

    # finalize: combine the per-core partial sums (scalar XLA ops, negligible)
    inv_n = jnp.float32(1.0 / n)
    ce = jnp.sum(ce_sum) * inv_n
    calib = jnp.abs(jnp.sum(conf_sum) - jnp.sum(corr_sum)) * inv_n
    return ce + jnp.float32(beta) * calib


def dca_loss_ref(logits, targets, beta=1.0):
    # pure-JAX reference matching the PyTorch module
    x = logits.astype(jnp.float32)
    probs = jax.nn.softmax(x, axis=1)
    conf = jnp.max(probs, axis=1)
    pred = jnp.argmax(probs, axis=1)
    acc = (pred == targets).astype(jnp.float32).mean()
    calib = jnp.abs(conf.mean() - acc)
    logp = jax.nn.log_softmax(x, axis=1)
    ce = -jnp.mean(jnp.take_along_axis(logp, targets[:, None], axis=1))
    return ce + beta * calib


if __name__ == "__main__":
    key = jax.random.PRNGKey(0)
    k1, k2 = jax.random.split(key)
    N, C = 300, 32
    logits = jax.random.normal(k1, (N, C), dtype=jnp.float32)
    targets = jax.random.randint(k2, (N,), 0, C, dtype=jnp.int32)

    ref = dca_loss_ref(logits, targets, beta=0.7)

    # Small explicit tile: exercises the 2-core grid split, multi-step
    # accumulation, and the masked ragged tail (300 rows -> 6 tiles of 56).
    loss = dca_loss(logits, targets, beta=0.7, tile_n=64)
    jax.block_until_ready(loss)
    assert jnp.allclose(loss, ref, atol=1e-5, rtol=1e-5), (loss, ref)

    # Auto tile sizing (single large tile here, grid (1,1) path).
    loss2 = dca_loss(logits, targets, beta=0.7)
    jax.block_until_ready(loss2)
    assert jnp.allclose(loss2, ref, atol=1e-5, rtol=1e-5), (loss2, ref)

    print("KERNEL_OK")
</pallas_src>

<mosaic_0001>
module attributes {stable_mosaic.version = 11 : i64} {
  func.func @dca_kernel(%arg0: i32, %arg1: i32, %arg2: memref<56x32xf32, #tpu.memory_space<vmem>>, %arg3: memref<56x1xi32, #tpu.memory_space<vmem>>, %arg4: memref<1x1x1xf32, #tpu.memory_space<vmem>>, %arg5: memref<1x1x1xf32, #tpu.memory_space<vmem>>, %arg6: memref<1x1x1xf32, #tpu.memory_space<vmem>>, %arg7: memref<1x1xf32, #tpu.memory_space<vmem>>, %arg8: memref<1x1xf32, #tpu.memory_space<vmem>>, %arg9: memref<1x1xf32, #tpu.memory_space<vmem>>) attributes {dimension_semantics = [#tpu.dimension_semantics<parallel>, #tpu.dimension_semantics<arbitrary>], iteration_bounds = array<i64: 2, 3>, scalar_prefetch = 0 : i64, scratch_operands = 3 : i64, tpu.core_type = #tpu.core_type<tc>, window_params = [{transform_indices = @transform_0, window_bounds = array<i64: 56, 32>}, {transform_indices = @transform_1, window_bounds = array<i64: 56, 1>}, {transform_indices = @transform_2, window_bounds = array<i64: 1, 1, 1>}, {transform_indices = @transform_3, window_bounds = array<i64: 1, 1, 1>}, {transform_indices = @transform_4, window_bounds = array<i64: 1, 1, 1>}]} {
    %c3_i32 = arith.constant 3 : i32
    %0 = arith.muli %arg0, %c3_i32 : i32
    %1 = arith.addi %0, %arg1 : i32
    %c0_i32 = arith.constant 0 : i32
    %2 = arith.cmpi eq, %arg1, %c0_i32 : i32
    %3 = arith.extui %2 : i1 to i32
    %c0_i32_0 = arith.constant 0 : i32
    %4 = arith.cmpi ne, %3, %c0_i32_0 : i32
    scf.if %4 {
      %cst_11 = arith.constant 0.000000e+00 : f32
      %45 = vector.broadcast %cst_11 : f32 to vector<1x1xf32>
      %c0_12 = arith.constant 0 : index
      %c0_13 = arith.constant 0 : index
      %46 = vector.load %arg7[%c0_12, %c0_13] : memref<1x1xf32, #tpu.memory_space<vmem>>, vector<1x1xf32>
      tpu.vector_store %arg7[%c0_12, %c0_13], %45 {strides = array<i32>} : memref<1x1xf32, #tpu.memory_space<vmem>>, vector<1x1xf32>,
      %cst_14 = arith.constant 0.000000e+00 : f32
      %47 = vector.broadcast %cst_14 : f32 to vector<1x1xf32>
      %c0_15 = arith.constant 0 : index
      %c0_16 = arith.constant 0 : index
      %48 = vector.load %arg8[%c0_15, %c0_16] : memref<1x1xf32, #tpu.memory_space<vmem>>, vector<1x1xf32>
      tpu.vector_store %arg8[%c0_15, %c0_16], %47 {strides = array<i32>} : memref<1x1xf32, #tpu.memory_space<vmem>>, vector<1x1xf32>,
      %cst_17 = arith.constant 0.000000e+00 : f32
      %49 = vector.broadcast %cst_17 : f32 to vector<1x1xf32>
      %c0_18 = arith.constant 0 : index
      %c0_19 = arith.constant 0 : index
      %50 = vector.load %arg9[%c0_18, %c0_19] : memref<1x1xf32, #tpu.memory_space<vmem>>, vector<1x1xf32>
      tpu.vector_store %arg9[%c0_18, %c0_19], %49 {strides = array<i32>} : memref<1x1xf32, #tpu.memory_space<vmem>>, vector<1x1xf32>,
    } else {
    }
    %c0 = arith.constant 0 : index
    %c0_1 = arith.constant 0 : index
    %5 = vector.load %arg2[%c0, %c0_1] : memref<56x32xf32, #tpu.memory_space<vmem>>, vector<56x32xf32>
    %c0_2 = arith.constant 0 : index
    %c0_3 = arith.constant 0 : index
    %6 = vector.load %arg3[%c0_2, %c0_3] : memref<56x1xi32, #tpu.memory_space<vmem>>, vector<56x1xi32>
    %cst = arith.constant dense<0xFF800000> : vector<56xf32>
    %7 = vector.multi_reduction <maximumf>, %5, %cst [1] : vector<56x32xf32> to vector<56xf32>
    %8 = vector.shape_cast %7 : vector<56xf32> to vector<56x1xf32>
    %9 = tpu.iota {dimensions = array<i32: 1>} : vector<56x32xi32>
    %10 = vector.broadcast %8 : vector<56x1xf32> to vector<56x32xf32>
    %11 = arith.cmpf oeq, %5, %10 : vector<56x32xf32>
    %c32_i32 = arith.constant 32 : i32
    %12 = vector.broadcast %c32_i32 : i32 to vector<56x32xi32>
    %13 = arith.select %11, %9, %12 : vector<56x32xi1>, vector<56x32xi32>
    %cst_4 = arith.constant dense<2147483647> : vector<56xi32>
    %14 = vector.multi_reduction <minsi>, %13, %cst_4 [1] : vector<56x32xi32> to vector<56xi32>
    %15 = vector.shape_cast %14 : vector<56xi32> to vector<56x1xi32>
    %16 = arith.cmpi eq, %15, %6 : vector<56x1xi32>
    %17 = arith.extui %16 : vector<56x1xi1> to vector<56x1xi32>
    %18 = arith.sitofp %17 : vector<56x1xi32> to vector<56x1xf32>
    %19 = vector.broadcast %6 : vector<56x1xi32> to vector<56x32xi32>
    %20 = arith.cmpi eq, %9, %19 : vector<56x32xi32>
    %cst_5 = arith.constant 0.000000e+00 : f32
    %21 = vector.broadcast %cst_5 : f32 to vector<56x32xf32>
    %22 = arith.select %20, %5, %21 : vector<56x32xi1>, vector<56x32xf32>
    %cst_6 = arith.constant dense<0.000000e+00> : vector<56xf32>
    %23 = vector.multi_reduction <add>, %22, %cst_6 [1] : vector<56x32xf32> to vector<56xf32>
    %24 = vector.shape_cast %23 : vector<56xf32> to vector<56x1xf32>
    %25 = vector.broadcast %8 : vector<56x1xf32> to vector<56x32xf32>
    %26 = arith.subf %5, %25 : vector<56x32xf32>
    %27 = math.exp %26 : vector<56x32xf32>
    %cst_7 = arith.constant dense<0.000000e+00> : vector<56xf32>
    %28 = vector.multi_reduction <add>, %27, %cst_7 [1] : vector<56x32xf32> to vector<56xf32>
    %29 = vector.shape_cast %28 : vector<56xf32> to vector<56x1xf32>
    %30 = math.log %29 : vector<56x1xf32>
    %31 = arith.addf %30, %8 : vector<56x1xf32>
    %32 = tpu.reciprocal %29 : vector<56x1xf32> -> vector<56x1xf32>
    %33 = arith.subf %31, %24 : vector<56x1xf32>
    %c1_i32 = arith.constant 1 : i32
    %34 = arith.addi %1, %c1_i32 : i32
    %c56_i32 = arith.constant 56 : i32
    %35 = arith.muli %34, %c56_i32 : i32
    %c300_i32 = arith.constant 300 : i32
    %36 = arith.cmpi sgt, %35, %c300_i32 : i32
    %37 = arith.extui %36 : i1 to i32
    %c0_i32_8 = arith.constant 0 : i32
    %38 = arith.cmpi ne, %37, %c0_i32_8 : i32
    scf.if %38 {
      %c56_i32_11 = arith.constant 56 : i32
      %45 = arith.muli %1, %c56_i32_11 : i32
      %46 = tpu.iota {dimensions = array<i32: 0>} : vector<56x1xi32>
      %47 = vector.broadcast %45 : i32 to vector<56x1xi32>
      %48 = arith.addi %47, %46 : vector<56x1xi32>
      %c300_i32_12 = arith.constant 300 : i32
      %49 = vector.broadcast %c300_i32_12 : i32 to vector<56x1xi32>
      %50 = arith.cmpi slt, %48, %49 : vector<56x1xi32>
      %cst_13 = arith.constant 0.000000e+00 : f32
      %51 = vector.broadcast %cst_13 : f32 to vector<56x1xf32>
      %c0_14 = arith.constant 0 : index
      %c0_15 = arith.constant 0 : index
      %52 = vector.load %arg7[%c0_14, %c0_15] : memref<1x1xf32, #tpu.memory_space<vmem>>, vector<1x1xf32>
      %53 = arith.select %50, %33, %51 : vector<56x1xi1>, vector<56x1xf32>
      %cst_16 = arith.constant dense<0.000000e+00> : vector<1xf32>
      %54 = vector.multi_reduction <add>, %53, %cst_16 [0] : vector<56x1xf32> to vector<1xf32>
      %55 = vector.shape_cast %54 : vector<1xf32> to vector<1x1xf32>
      %56 = arith.addf %52, %55 : vector<1x1xf32>
      %c0_17 = arith.constant 0 : index
      %c0_18 = arith.constant 0 : index
      %57 = vector.load %arg7[%c0_17, %c0_18] : memref<1x1xf32, #tpu.memory_space<vmem>>, vector<1x1xf32>
      tpu.vector_store %arg7[%c0_17, %c0_18], %56 {strides = array<i32>} : memref<1x1xf32, #tpu.memory_space<vmem>>, vector<1x1xf32>,
      %c0_19 = arith.constant 0 : index
      %c0_20 = arith.constant 0 : index
      %58 = vector.load %arg8[%c0_19, %c0_20] : memref<1x1xf32, #tpu.memory_space<vmem>>, vector<1x1xf32>
      %59 = arith.select %50, %32, %51 : vector<56x1xi1>, vector<56x1xf32>
      %cst_21 = arith.constant dense<0.000000e+00> : vector<1xf32>
      %60 = vector.multi_reduction <add>, %59, %cst_21 [0] : vector<56x1xf32> to vector<1xf32>
      %61 = vector.shape_cast %60 : vector<1xf32> to vector<1x1xf32>
      %62 = arith.addf %58, %61 : vector<1x1xf32>
      %c0_22 = arith.constant 0 : index
      %c0_23 = arith.constant 0 : index
      %63 = vector.load %arg8[%c0_22, %c0_23] : memref<1x1xf32, #tpu.memory_space<vmem>>, vector<1x1xf32>
      tpu.vector_store %arg8[%c0_22, %c0_23], %62 {strides = array<i32>} : memref<1x1xf32, #tpu.memory_space<vmem>>, vector<1x1xf32>,
      %c0_24 = arith.constant 0 : index
      %c0_25 = arith.constant 0 : index
      %64 = vector.load %arg9[%c0_24, %c0_25] : memref<1x1xf32, #tpu.memory_space<vmem>>, vector<1x1xf32>
      %65 = arith.select %50, %18, %51 : vector<56x1xi1>, vector<56x1xf32>
      %cst_26 = arith.constant dense<0.000000e+00> : vector<1xf32>
      %66 = vector.multi_reduction <add>, %65, %cst_26 [0] : vector<56x1xf32> to vector<1xf32>
      %67 = vector.shape_cast %66 : vector<1xf32> to vector<1x1xf32>
      %68 = arith.addf %64, %67 : vector<1x1xf32>
      %c0_27 = arith.constant 0 : index
      %c0_28 = arith.constant 0 : index
      %69 = vector.load %arg9[%c0_27, %c0_28] : memref<1x1xf32, #tpu.memory_space<vmem>>, vector<1x1xf32>
      tpu.vector_store %arg9[%c0_27, %c0_28], %68 {strides = array<i32>} : memref<1x1xf32, #tpu.memory_space<vmem>>, vector<1x1xf32>,
    } else {
    }
    %true = arith.constant true
    %39 = arith.xori %36, %true : i1
    %40 = arith.extui %39 : i1 to i32
    %c0_i32_9 = arith.constant 0 : i32
    %41 = arith.cmpi ne, %40, %c0_i32_9 : i32
    scf.if %41 {
      %c0_11 = arith.constant 0 : index
      %c0_12 = arith.constant 0 : index
      %45 = vector.load %arg7[%c0_11, %c0_12] : memref<1x1xf32, #tpu.memory_space<vmem>>, vector<1x1xf32>
      %cst_13 = arith.constant dense<0.000000e+00> : vector<1xf32>
      %46 = vector.multi_reduction <add>, %33, %cst_13 [0] : vector<56x1xf32> to vector<1xf32>
      %47 = vector.shape_cast %46 : vector<1xf32> to vector<1x1xf32>
      %48 = arith.addf %45, %47 : vector<1x1xf32>
      %c0_14 = arith.constant 0 : index
      %c0_15 = arith.constant 0 : index
      %49 = vector.load %arg7[%c0_14, %c0_15] : memref<1x1xf32, #tpu.memory_space<vmem>>, vector<1x1xf32>
      tpu.vector_store %arg7[%c0_14, %c0_15], %48 {strides = array<i32>} : memref<1x1xf32, #tpu.memory_space<vmem>>, vector<1x1xf32>,
      %c0_16 = arith.constant 0 : index
      %c0_17 = arith.constant 0 : index
      %50 = vector.load %arg8[%c0_16, %c0_17] : memref<1x1xf32, #tpu.memory_space<vmem>>, vector<1x1xf32>
      %cst_18 = arith.constant dense<0.000000e+00> : vector<1xf32>
      %51 = vector.multi_reduction <add>, %32, %cst_18 [0] : vector<56x1xf32> to vector<1xf32>
      %52 = vector.shape_cast %51 : vector<1xf32> to vector<1x1xf32>
      %53 = arith.addf %50, %52 : vector<1x1xf32>
      %c0_19 = arith.constant 0 : index
      %c0_20 = arith.constant 0 : index
      %54 = vector.load %arg8[%c0_19, %c0_20] : memref<1x1xf32, #tpu.memory_space<vmem>>, vector<1x1xf32>
      tpu.vector_store %arg8[%c0_19, %c0_20], %53 {strides = array<i32>} : memref<1x1xf32, #tpu.memory_space<vmem>>, vector<1x1xf32>,
      %c0_21 = arith.constant 0 : index
      %c0_22 = arith.constant 0 : index
      %55 = vector.load %arg9[%c0_21, %c0_22] : memref<1x1xf32, #tpu.memory_space<vmem>>, vector<1x1xf32>
      %cst_23 = arith.constant dense<0.000000e+00> : vector<1xf32>
      %56 = vector.multi_reduction <add>, %18, %cst_23 [0] : vector<56x1xf32> to vector<1xf32>
      %57 = vector.shape_cast %56 : vector<1xf32> to vector<1x1xf32>
      %58 = arith.addf %55, %57 : vector<1x1xf32>
      %c0_24 = arith.constant 0 : index
      %c0_25 = arith.constant 0 : index
      %59 = vector.load %arg9[%c0_24, %c0_25] : memref<1x1xf32, #tpu.memory_space<vmem>>, vector<1x1xf32>
      tpu.vector_store %arg9[%c0_24, %c0_25], %58 {strides = array<i32>} : memref<1x1xf32, #tpu.memory_space<vmem>>, vector<1x1xf32>,
    } else {
    }
    %c2_i32 = arith.constant 2 : i32
    %42 = arith.cmpi eq, %arg1, %c2_i32 : i32
    %43 = arith.extui %42 : i1 to i32
    %c0_i32_10 = arith.constant 0 : i32
    %44 = arith.cmpi ne, %43, %c0_i32_10 : i32
    scf.if %44 {
      %c0_11 = arith.constant 0 : index
      %c0_12 = arith.constant 0 : index
      %45 = vector.load %arg7[%c0_11, %c0_12] : memref<1x1xf32, #tpu.memory_space<vmem>>, vector<1x1xf32>
      %46 = vector.shape_cast %45 : vector<1x1xf32> to vector<1x1x1xf32>
      %c0_13 = arith.constant 0 : index
      %c0_14 = arith.constant 0 : index
      %c0_15 = arith.constant 0 : index
      %47 = vector.load %arg4[%c0_13, %c0_14, %c0_15] : memref<1x1x1xf32, #tpu.memory_space<vmem>>, vector<1x1x1xf32>
      tpu.vector_store %arg4[%c0_13, %c0_14, %c0_15], %46 {strides = array<i32>} : memref<1x1x1xf32, #tpu.memory_space<vmem>>, vector<1x1x1xf32>,
      %c0_16 = arith.constant 0 : index
      %c0_17 = arith.constant 0 : index
      %48 = vector.load %arg8[%c0_16, %c0_17] : memref<1x1xf32, #tpu.memory_space<vmem>>, vector<1x1xf32>
      %49 = vector.shape_cast %48 : vector<1x1xf32> to vector<1x1x1xf32>
      %c0_18 = arith.constant 0 : index
      %c0_19 = arith.constant 0 : index
      %c0_20 = arith.constant 0 : index
      %50 = vector.load %arg5[%c0_18, %c0_19, %c0_20] : memref<1x1x1xf32, #tpu.memory_space<vmem>>, vector<1x1x1xf32>
      tpu.vector_store %arg5[%c0_18, %c0_19, %c0_20], %49 {strides = array<i32>} : memref<1x1x1xf32, #tpu.memory_space<vmem>>, vector<1x1x1xf32>,
      %c0_21 = arith.constant 0 : index
      %c0_22 = arith.constant 0 : index
      %51 = vector.load %arg9[%c0_21, %c0_22] : memref<1x1xf32, #tpu.memory_space<vmem>>, vector<1x1xf32>
      %52 = vector.shape_cast %51 : vector<1x1xf32> to vector<1x1x1xf32>
      %c0_23 = arith.constant 0 : index
      %c0_24 = arith.constant 0 : index
      %c0_25 = arith.constant 0 : index
      %53 = vector.load %arg6[%c0_23, %c0_24, %c0_25] : memref<1x1x1xf32, #tpu.memory_space<vmem>>, vector<1x1x1xf32>
      tpu.vector_store %arg6[%c0_23, %c0_24, %c0_25], %52 {strides = array<i32>} : memref<1x1x1xf32, #tpu.memory_space<vmem>>, vector<1x1x1xf32>,
    } else {
    }
    return
  }
  func.func @transform_0(%arg0: i32, %arg1: i32) -> (i32, i32) {
    %c3_i32 = arith.constant 3 : i32
    %0 = arith.muli %arg0, %c3_i32 : i32
    %1 = arith.addi %0, %arg1 : i32
    %c5_i32 = arith.constant 5 : i32
    %2 = arith.minsi %1, %c5_i32 : i32
    %c0_i32 = arith.constant 0 : i32
    %c0_i32_0 = arith.constant 0 : i32
    return %2, %c0_i32 : i32, i32
  }
  func.func @transform_1(%arg0: i32, %arg1: i32) -> (i32, i32) {
    %c3_i32 = arith.constant 3 : i32
    %0 = arith.muli %arg0, %c3_i32 : i32
    %1 = arith.addi %0, %arg1 : i32
    %c5_i32 = arith.constant 5 : i32
    %2 = arith.minsi %1, %c5_i32 : i32
    %c0_i32 = arith.constant 0 : i32
    %c0_i32_0 = arith.constant 0 : i32
    return %2, %c0_i32 : i32, i32
  }
  func.func @transform_2(%arg0: i32, %arg1: i32) -> (i32, i32, i32) {
    %c0_i32 = arith.constant 0 : i32
    %c0_i32_0 = arith.constant 0 : i32
    %c0_i32_1 = arith.constant 0 : i32
    return %arg0, %c0_i32, %c0_i32_0 : i32, i32, i32
  }
  func.func @transform_3(%arg0: i32, %arg1: i32) -> (i32, i32, i32) {
    %c0_i32 = arith.constant 0 : i32
    %c0_i32_0 = arith.constant 0 : i32
    %c0_i32_1 = arith.constant 0 : i32
    return %arg0, %c0_i32, %c0_i32_0 : i32, i32, i32
  }
  func.func @transform_4(%arg0: i32, %arg1: i32) -> (i32, i32, i32) {
    %c0_i32 = arith.constant 0 : i32
    %c0_i32_0 = arith.constant 0 : i32
    %c0_i32_1 = arith.constant 0 : i32
    return %arg0, %c0_i32, %c0_i32_0 : i32, i32, i32
  }
}

</mosaic_0001>

<bundles_post_ra>
// kernel: tpu_custom_call.1
= control target key start
LH: loop header
LB: loop body
LE: loop exit
PB: predicated region body
PF: predicated region fallthrough
CT: control target
= control target key end

     0   :  { %s1133_s15 = smov 0   ;;  %s1135_s16 = smov 0   ;;  %s1606_s0 = inlined_call_operand.vmem [shape: f32[300,32], index: 0, kind: input, shape index: {}]   ;;  %s1607_s1 = inlined_call_operand.vmem [shape: s32[300,1], index: 1, kind: input, shape index: {}]   ;;  %s1608_s2 = inlined_call_operand.vmem [shape: f32[2,1,1], index: 2, kind: output, shape index: {0}]   ;;  %s1609_s3 = inlined_call_operand.vmem [shape: f32[2,1,1], index: 3, kind: output, shape index: {1}]   ;;  %s1610_s4 = inlined_call_operand.vmem [shape: f32[2,1,1], index: 4, kind: output, shape index: {2}]  }
   0x1   :  { %s1137_s17 = smov 0   ;;  %s1139_s18 = smov 0  }
   0x2   :  { %s1141_s19 = smov 0  }
   0x3 LB: > { %s24_s20 = sadd.s32 1, %s1095_s17  ;;  %s27_s21 = sadd.s32 1, %s1099_s18  ;;  %s1103_s19 = sphi %s1141_s19, %s15_s19   ;;  %s1099_s18 = sphi %s1139_s18, %s1614_s18   ;;  %s1095_s17 = sphi %s1137_s17, %s1613_s17   ;;  %s1091_s16 = sphi %s1135_s16, %s1612_s16   ;;  %s1087_s15 = sphi %s1133_s15, %s1611_s15  }
   0x4   : > { %p25_p0 = scmp.ge.s32.totalorder %s24_s20, 3  ;;  %p962_p1 = scmp.ge.s32.totalorder %s1103_s19, 1 }
   0x5   : > { %p239_p2 = scmp.lt.s32.totalorder %s1103_s19, 7 }
   0x6   : > { %s1616_s20 = smov (%p25_p0, %s24_s20), 0  ;;  %s1618_s21 = smov (!%p25_p0, %s27_s21), %s1099_s18 }
   0x7   : > { %p240_p3 = pnand %p962_p1, %p239_p2  ;;  %p29_p4 = scmp.ge.s32.totalorder %s1618_s21, 2 }
   0x8   : > { %s290_s22 = smul.u32 (!%p240_p3), 3, %s1091_s16  ;;  %p334_p5 = scmp.lt.s32.totalorder (!%p240_p3), %s1091_s16, 1 }
   0x9   : > { %s1620_s21 = smov (%p29_p4, %s1618_s21), 0  ;;  %243 = sbr.rel (%p240_p3) target bundleno = 616 (0x268), region = 28 }
   0xa   : > { %s1166_s23 = sadd.s32 (!%p240_p3), %s1087_s15, %s290_s22  ;;  %p965_p8 = scmp.ne.s32.totalorder (!%p240_p3), %s1087_s15, 0 }
   0xb   : > { %p292_p6 = scmp.lt.s32.totalorder (!%p240_p3), %s1166_s23, 5 }
  0x10   : > { %s1622_s16 = smov (!%p334_p5, %s1091_s16), 1  ;;  %vm349_vm0 = vcmask (!%p965_p8), 0   ;;  %v1105_v0 = vmov (!%p965_p8), 0.0  }
  0x11   : > { %s293_s24 = scalar_select %p292_p6, %s1166_s23, 5 }
  0x12   : > { %s336_s27 = scalar_lea.vmem %s1608_s2, %s1622_s16  ;;  %s339_s30 = scalar_lea.vmem %s1609_s3, %s1622_s16  ;;  %350 = vst.msk [vmem:[#allocation2] sm:$0x1] (!%p965_p8), %vm349_vm0, %v1105_v0  ;;  %351 = vst.msk [vmem:[#allocation3] sm:$0x1] (!%p965_p8), %vm349_vm0, %v1105_v0 }
  0x13   : > { %s294_s5 = smul.u32 7, %s293_s24  ;;  %s342_s8 = scalar_lea.vmem %s1610_s4, %s1622_s16  ;;  %352 = vst.msk [vmem:[#allocation4] sm:$0x1] (!%p965_p8), %vm349_vm0, %v1105_v0 }
  0x14   : > { %348 = sbr.rel (%p965_p8) target bundleno = 27 (0x1b), region = 32 }
  0x15   : > { %p299_p7 = scmp.lt.s32.totalorder %s294_s5, 37 }
  0x17   : > { %s1624_s5 = smov (!%p299_p7, %s294_s5), 37 }
  0x18   : > { %s963_s9 = sshll.u32 %s1624_s5, 3 }
  0x19   : > { %s302_s12 = scalar_lea.vmem %s1606_s0, %s963_s9  ;;  %s1190_s22 = scalar_lea.vmem %s1607_s1, %s963_s9 }
  0x1b PF: > { %v1193_v1 = vld [vmem:[%s302_s12] sm:$0xff]  ;;  %vm367_vm1 = vcmask 261120   ;;  %v1195_v2 = vld [vmem:[%s302_s12 + $0x10] sm:$0xff]  ;;  %v1197_v3 = vld [vmem:[%s302_s12 + $0x8] sm:$0xff]  ;;  %v1106_v15 = vmov 0   ;;  %v389_v16 = vlaneseq  ;;  %s664_s24 = sadd.s32 1, %s1166_s23 }
  0x1c   : > { %v368_v4 = vsel %vm367_vm1, %v1193_v1, -inf  ;;  %v374_v5 = vsel %vm367_vm1, %v1195_v2, -inf  ;;  %v1203_v6 = vld [vmem:[%s302_s12 + $0x18] sm:$0xff]  ;;  %v371_v7 = vsel %vm367_vm1, %v1197_v3, -inf  ;;  %v1209_v9 = vld [vmem:[%s302_s12 + $0x20] sm:$0xff]  ;;  %v1211_v10 = vld [vmem:[%s302_s12 + $0x28] sm:$0xff]  ;;  %1022 = vset.pattern.permute.xlu1 %v1106_v15  ;;  %1021 = vset.pattern.permute.xlu0 %v1106_v15 }
  0x1d   : > { %369 = vmax.xlane.f32.xlu0 %v368_v4  ;;  %375 = vmax.xlane.f32.xlu1 %v374_v5  ;;  %v377_v8 = vsel %vm367_vm1, %v1203_v6, -inf  ;;  %v380_v11 = vsel %vm367_vm1, %v1209_v9, -inf  ;;  %v383_v12 = vsel %vm367_vm1, %v1211_v10, -inf  ;;  %v1217_v13 = vld [vmem:[%s302_s12 + $0x30] sm:$0xff]  ;;  %v1222_v17 = vand.u32 127, %v389_v16  ;;  %v1297_v48 = vld [vmem:[%s1190_s22 + $0x8] sm:$0xff] }
  0x1e   : > { %v386_v14 = vsel %vm367_vm1, %v1217_v13, -inf  ;;  %v1301_v49 = vld [vmem:[%s1190_s22 + $0x10] sm:$0xff]  ;;  %v1305_v50 = vld [vmem:[%s1190_s22 + $0x18] sm:$0xff]  ;;  %v1308_v51 = vld [vmem:[%s1190_s22] sm:$0xff]  ;;  %s1414_s25 = smul.u32 56, %s664_s24 }
  0x1f   : > { %v1312_v52 = vld [vmem:[%s1190_s22 + $0x20] sm:$0xff]  ;;  %v1317_v53 = vld [vmem:[%s1190_s22 + $0x28] sm:$0xff]  ;;  %v1333_v59 = vld [vmem:[%s1190_s22 + $0x30] sm:$0xff] }
  0x20   : > { %p973_p9 = scmp.le.s32.totalorder %s1414_s25, 300 }
  0x21   : > { %372 = vmax.xlane.f32.xlu0 %v371_v7  ;;  %378 = vmax.xlane.f32.xlu1 %v377_v8  ;;  %s670_s26 = smul.u32 (!%p973_p9), 56, %s1166_s23 }
  0x25   : > { %381 = vmax.xlane.f32.xlu0 %v380_v11  ;;  %384 = vmax.xlane.f32.xlu1 %v383_v12 }
  0x29   : > { %387 = vmax.xlane.f32.xlu0 %v386_v14 }
  0xaa   : > { %v1224_v18 = vpop.xlane.xlu0 %369  ;;  %v1226_v19 = vpop.xlane.xlu1 %375 }
  0xab   : > { %vm391_vm2 = vcmp.eq.f32.partialorder %v1193_v1, %v1224_v18  ;;  %vm393_vm3 = vcmp.eq.f32.partialorder %v1195_v2, %v1226_v19  ;;  %v587_v12 = vsub.f32 %v1193_v1, %v1224_v18 }
  0xac   : > { %v398_v20 = vsel %vm391_vm2, %v1222_v17, 32  ;;  %v400_v21 = vsel %vm393_vm3, %v1222_v17, 32 }
  0xad   : > { %v1235_v22 = vsel %vm367_vm1, %v398_v20, 2147483647  ;;  %v1243_v26 = vsel %vm367_vm1, %v400_v21, 2147483647  ;;  %v589_v20 = vsub.f32 %v1195_v2, %v1226_v19 }
  0xae   : > { %v1237_v23 = vpop.xlane.xlu0 %372  ;;  %v1239_v24 = vpop.xlane.xlu1 %378  ;;  %v407_v25 = vshra.s32 %v1235_v22, 16  ;;  %v437_v28 = vshra.s32 %v1243_v26, 16 }
  0xaf   : > { %vm392_vm4 = vcmp.eq.f32.partialorder %v1197_v3, %v1237_v23  ;;  %vm394_vm5 = vcmp.eq.f32.partialorder %v1203_v6, %v1239_v24  ;;  %v588_v60 = vsub.f32 %v1197_v3, %v1237_v23  ;;  %v590_v63 = vsub.f32 %v1203_v6, %v1239_v24 }
  0xb0   : > { %v1249_v27 = vcvt.s32.f32 %v407_v25  ;;  %v399_v29 = vsel %vm392_vm4, %v1222_v17, 32  ;;  %v401_v30 = vsel %vm394_vm5, %v1222_v17, 32  ;;  %v1259_v33 = vcvt.s32.f32 %v437_v28 }
  0xb1   : > { %v1262_v34 = vsel %vm367_vm1, %v399_v29, 2147483647  ;;  %v1265_v35 = vsel %vm367_vm1, %v401_v30, 2147483647  ;;  %v596_v62 = vmul.f32 1.442695, %v588_v60 }
  0xb2   : > { %410 = vmin.xlane.f32.xlu1 %v1249_v27  ;;  %v1255_v31 = vpop.xlane.xlu0 %381  ;;  %v1257_v32 = vpop.xlane.xlu1 %384  ;;  %v422_v36 = vshra.s32 %v1262_v34, 16  ;;  %v452_v37 = vshra.s32 %v1265_v35, 16  ;;  %v600_v5 = vmul.f32 1.442695, %v590_v63  ;;  %v594_v25 = vmul.f32 1.442695, %v587_v12 }
  0xb3   : > { %vm395_vm6 = vcmp.eq.f32.partialorder %v1209_v9, %v1255_v31  ;;  %vm396_vm7 = vcmp.eq.f32.partialorder %v1211_v10, %v1257_v32  ;;  %1023 = vpow2.f32 %v596_v62  ;;  %v592_v7 = vsub.f32 %v1211_v10, %v1257_v32 }
  0xb4   : > { %v402_v38 = vsel %vm395_vm6, %v1222_v17, 32  ;;  %v403_v39 = vsel %vm396_vm7, %v1222_v17, 32  ;;  %v1276_v40 = vcvt.s32.f32 %v422_v36  ;;  %v1286_v44 = vcvt.s32.f32 %v452_v37 }
  0xb5   : > { %v1279_v41 = vsel %vm367_vm1, %v402_v38, 2147483647  ;;  %v1283_v43 = vsel %vm367_vm1, %v403_v39, 2147483647  ;;  %1025 = vpow2.f32 %v600_v5  ;;  %v604_v11 = vmul.f32 1.442695, %v592_v7 }
  0xb6   : > { %440 = vmin.xlane.f32.xlu1 %v1259_v33  ;;  %v467_v42 = vshra.s32 %v1279_v41, 16  ;;  %425 = vmin.xlane.f32.xlu0 %v1276_v40  ;;  %v482_v45 = vshra.s32 %v1283_v43, 16  ;;  %v1320_v54 = vpop.xlane.xlu0 %387  ;;  %v598_v36 = vmul.f32 1.442695, %v589_v20  ;;  %v591_v37 = vsub.f32 %v1209_v9, %v1255_v31 }
  0xb7   : > { %vm397_vm8 = vcmp.eq.f32.partialorder %v1217_v13, %v1320_v54  ;;  %1027 = vpow2.f32 %v604_v11  ;;  %v406_v7 = vand.u32 65535, %v1235_v22 }
  0xb8   : > { %v1289_v46 = vcvt.s32.f32 %v467_v42  ;;  %v1293_v47 = vcvt.s32.f32 %v482_v45  ;;  %v404_v55 = vsel %vm397_vm8, %v1222_v17, 32  ;;  %1029 = vpow2.f32 %v594_v25 }
  0xb9   : > { %v1326_v56 = vsel %vm367_vm1, %v404_v55, 2147483647  ;;  %1031 = vpow2.f32 %v598_v36  ;;  %v593_v55 = vsub.f32 %v1217_v13, %v1320_v54  ;;  %v408_v20 = vcvt.s32.f32 %v406_v7 }
  0xba   : > { %470 = vmin.xlane.f32.xlu1 %v1289_v46  ;;  %455 = vmin.xlane.f32.xlu0 %v1286_v44  ;;  %v497_v57 = vshra.s32 %v1326_v56, 16  ;;  %v496_v7 = vand.u32 65535, %v1326_v56 }
  0xbb   : > { %v606_v11 = vmul.f32 1.442695, %v593_v55 }
  0xbc   : > { %v1329_v58 = vcvt.s32.f32 %v497_v57 }
  0xbd   : > { %v1024_v29 = vpop.eup %1023 }
  0xbe   : > { %485 = vmin.xlane.f32.xlu0 %v1293_v47  ;;  %v611_v39 = vsel %vm367_vm1, %v1024_v29, 0.0  ;;  %v466_v29 = vand.u32 65535, %v1279_v41 }
  0xbf   : > { %v1026_v42 = vpop.eup %1025 }
  0xc0   : > { %v617_v57 = vsel %vm367_vm1, %v1026_v42, 0.0 }
  0xc1   : > { %v1028_v62 = vpop.eup %1027 }
  0xc2   : > { %v623_v12 = vsel %vm367_vm1, %v1028_v62, 0.0 }
  0xcb   : > { %535 = vperm.xlu1 %1022, %v1297_v48  }
  0xcf   : > { %538 = vperm.xlu1 %1022, %v1301_v49  }
  0xd3   : > { %541 = vperm.xlu1 %1022, %v1305_v50  }
  0xd4   : > { %532 = vperm.xlu0 %1021, %v1308_v51  }
  0xd7   : > { %544 = vperm.xlu1 %1022, %v1312_v52  }
  0xdb   : > { %547 = vperm.xlu1 %1022, %v1317_v53  }
  0xff   : > { %500 = vmin.xlane.f32.xlu1 %v1329_v58 }
 0x110   : > { %550 = vperm.xlu1 %1022, %v1333_v59  }
 0x13f   : > { %v1338_v61 = vpop.xlane.xlu1 %410 }
 0x140   : > { %vm412_vm12 = vcmp.eq.f32.partialorder %v1249_v27, %v1338_v61 }
 0x141   : > { %v413_v25 = vsel %vm412_vm12, %v408_v20, inf }
 0x143   : > { %v1342_v0 = vpop.xlane.xlu1 %440  ;;  %v1344_v4 = vpop.xlane.xlu0 %425 }
 0x144   : > { %vm442_vm13 = vcmp.eq.f32.partialorder %v1259_v33, %v1342_v0  ;;  %v421_v33 = vand.u32 65535, %v1262_v34  ;;  %vm427_vm15 = vcmp.eq.f32.partialorder %v1276_v40, %v1344_v4 }
 0x147   : > { %v1348_v8 = vpop.xlane.xlu1 %470  ;;  %v1352_v14 = vpop.xlane.xlu0 %455 }
 0x148   : > { %vm472_vm14 = vcmp.eq.f32.partialorder %v1289_v46, %v1348_v8  ;;  %v451_v46 = vand.u32 65535, %v1265_v35  ;;  %vm457_vm0 = vcmp.eq.f32.partialorder %v1286_v44, %v1352_v14 }
 0x14b   : > { %v536_v15 = vpop.permute.xlu1 %535  ;;  %v1359_v30 = vpop.xlane.xlu0 %485 }
 0x14c   : > { %vm553_vm9 = vcmp.eq.s32.totalorder %v1222_v17, %v536_v15  ;;  %vm487_vm2 = vcmp.eq.f32.partialorder %v1293_v47, %v1359_v30 }
 0x14d   : > { %v560_v21 = vsel %vm553_vm9, %v1197_v3, 0.0  ;;  %v602_v3 = vmul.f32 1.442695, %v591_v37  ;;  %v468_v37 = vcvt.s32.f32 %v466_v29 }
 0x14e   : > { %v569_v28 = vsel %vm367_vm1, %v560_v21, 0.0  ;;  %v436_v21 = vand.u32 65535, %v1243_v26 }
 0x14f   : > { %570 = vadd.xlane.f32.xlu0 %v569_v28  ;;  %v539_v38 = vpop.permute.xlu1 %538  ;;  %1033 = vpow2.f32 %v602_v3  ;;  %v423_v3 = vcvt.s32.f32 %v421_v33 }
 0x150   : > { %vm554_vm10 = vcmp.eq.s32.totalorder %v1222_v17, %v539_v38  ;;  %1035 = vpow2.f32 %v606_v11  ;;  %v438_v28 = vcvt.s32.f32 %v436_v21  ;;  %v473_v38 = vsel %vm472_vm14, %v468_v37, inf }
 0x151   : > { %v561_v5 = vsel %vm554_vm10, %v1195_v2, 0.0  ;;  %v428_v55 = vsel %vm427_vm15, %v423_v3, inf  ;;  %v498_v11 = vcvt.s32.f32 %v496_v7  ;;  %v477_v3 = vcvt.f32.s32 %v1348_v8 }
 0x152   : > { %v572_v15 = vsel %vm367_vm1, %v561_v5, 0.0  ;;  %v443_v36 = vsel %vm442_vm13, %v438_v28, inf }
 0x153   : > { %612 = vadd.xlane.f32.xlu0 %v611_v39  ;;  %v533_v45 = vpop.permute.xlu0 %532 }
 0x154   : > { %vm552_vm11 = vcmp.eq.s32.totalorder %v1222_v17, %v533_v45  ;;  %v542_v45 = vpop.permute.xlu1 %541 }
 0x155   : > { %v559_v60 = vsel %vm552_vm11, %v1193_v1, 0.0  ;;  %v1030_v1 = vpop.eup %1029  ;;  %vm555_vm4 = vcmp.eq.s32.totalorder %v1222_v17, %v542_v45 }
 0x156   : > { %v566_v63 = vsel %vm367_vm1, %v559_v60, 0.0  ;;  %v1032_v2 = vpop.eup %1031  ;;  %v608_v22 = vsel %vm367_vm1, %v1030_v1, 0.0  ;;  %v481_v60 = vand.u32 65535, %v1283_v43 }
 0x157   : > { %618 = vadd.xlane.f32.xlu0 %v617_v57  ;;  %567 = vadd.xlane.f32.xlu1 %v566_v63  ;;  %v614_v27 = vsel %vm367_vm1, %v1032_v2, 0.0  ;;  %v453_v57 = vcvt.s32.f32 %v451_v46 }
 0x158   : > { %v545_v62 = vpop.permute.xlu1 %544  ;;  %v483_v40 = vcvt.s32.f32 %v481_v60 }
 0x159   : > { %v1034_v26 = vpop.eup %1033  ;;  %v458_v34 = vsel %vm457_vm0, %v453_v57, inf  ;;  %vm556_vm3 = vcmp.eq.s32.totalorder %v1222_v17, %v545_v62 }
 0x15a   : > { %v620_v39 = vsel %vm367_vm1, %v1034_v26, 0.0  ;;  %v1036_v42 = vpop.eup %1035  ;;  %v488_v63 = vsel %vm487_vm2, %v483_v40, inf  ;;  %v563_v35 = vsel %vm556_vm3, %v1209_v9, 0.0  ;;  %v447_v26 = vcvt.f32.s32 %v1342_v0 }
 0x15b   : > { %624 = vadd.xlane.f32.xlu0 %v623_v12  ;;  %573 = vadd.xlane.f32.xlu1 %v572_v15  ;;  %v626_v41 = vsel %vm367_vm1, %v1036_v42, 0.0  ;;  %v578_v5 = vsel %vm367_vm1, %v563_v35, 0.0  ;;  %v562_v12 = vsel %vm555_vm4, %v1203_v6, 0.0  ;;  %v1107_v0 = vmov 0.0  }
 0x15c   : > { %v548_v44 = vpop.permute.xlu1 %547  ;;  %v575_v56 = vsel %vm367_vm1, %v562_v12, 0.0  ;;  %v448_v45 = vshll.u32 %v447_v26, 16  ;;  %vm747_vm4 = vcmask (!%p973_p9), 7168  }
 0x15d   : > { %vm557_vm6 = vcmp.eq.s32.totalorder %v1222_v17, %v548_v44 }
 0x15e   : > { %v564_v20 = vsel %vm557_vm6, %v1211_v10, 0.0  ;;  %v417_v10 = vcvt.f32.s32 %v1338_v61 }
 0x15f   : > { %414 = vmin.xlane.f32.xlu0 %v413_v25  ;;  %609 = vadd.xlane.f32.xlu1 %v608_v22 }
 0x163   : > { %444 = vmin.xlane.f32.xlu0 %v443_v36  ;;  %615 = vadd.xlane.f32.xlu1 %v614_v27  ;;  %v418_v27 = vshll.u32 %v417_v10, 16 }
 0x167   : > { %474 = vmin.xlane.f32.xlu0 %v473_v38  ;;  %621 = vadd.xlane.f32.xlu1 %v620_v39 }
 0x16b   : > { %627 = vadd.xlane.f32.xlu1 %v626_v41 }
 0x16f   : > { %429 = vmin.xlane.f32.xlu1 %v428_v55 }
 0x173   : > { %459 = vmin.xlane.f32.xlu1 %v458_v34  ;;  %v478_v34 = vshll.u32 %v477_v3, 16 }
 0x177   : > { %489 = vmin.xlane.f32.xlu1 %v488_v63 }
 0x17b   : > { %579 = vadd.xlane.f32.xlu1 %v578_v5 }
 0x18c   : > { %v1401_v43 = vpop.xlane.xlu1 %500 }
 0x18d   : > { %vm502_vm5 = vcmp.eq.f32.partialorder %v1329_v58, %v1401_v43  ;;  %v581_v58 = vsel %vm367_vm1, %v564_v20, 0.0 }
 0x18e   : > { %v503_v47 = vsel %vm502_vm5, %v498_v11, inf  ;;  %v432_v11 = vcvt.f32.s32 %v1344_v4 }
 0x18f   : > { %504 = vmin.xlane.f32.xlu0 %v503_v47 }
 0x190   : > { %v551_v9 = vpop.permute.xlu1 %550  ;;  %v433_v20 = vshll.u32 %v432_v11, 16 }
 0x191   : > { %vm558_vm7 = vcmp.eq.s32.totalorder %v1222_v17, %v551_v9 }
 0x192   : > { %v565_v15 = vsel %vm558_vm7, %v1217_v13, 0.0  ;;  %vm715_vm7 = vcmask (!%p973_p9), 0  }
 0x193   : > { %576 = vadd.xlane.f32.xlu0 %v575_v56  ;;  %v584_v1 = vsel %vm367_vm1, %v565_v15, 0.0 }
 0x194   : > { %585 = vadd.xlane.f32.xlu1 %v584_v1 }
 0x197   : > { %582 = vadd.xlane.f32.xlu0 %v581_v58  ;;  %v462_v58 = vcvt.f32.s32 %v1352_v14 }
 0x1dc   : > { %v571_v6 = vpop.xlane.xlu0 %570 }
 0x1e0   : > { %v613_v21 = vpop.xlane.xlu0 %612 }
 0x1e1   : > { %1037 = vlog2.f32 %v613_v21 }
 0x1e2   : > { %1039 = vrcp.f32 %v613_v21 }
 0x1e4   : > { %v1416_v17 = vpop.xlane.xlu0 %618  ;;  %v568_v25 = vpop.xlane.xlu1 %567 }
 0x1e5   : > { %1041 = vrcp.f32 %v1416_v17 }
 0x1e8   : > { %v1419_v13 = vpop.xlane.xlu0 %624  ;;  %v574_v2 = vpop.xlane.xlu1 %573 }
 0x1e9   : > { %1043 = vrcp.f32 %v1419_v13 }
 0x1eb   : > { %v1038_v22 = vpop.eup %1037 }
 0x1ec   : > { %v1423_v28 = vpop.eup %1039  ;;  %v632_v29 = vmul.f32 0.6931472, %v1038_v22  ;;  %v415_v36 = vpop.xlane.xlu0 %414 }
 0x1ed   : > { %v610_v37 = vpop.xlane.xlu1 %609  ;;  %v416_v38 = vcvt.f32.s32 %v415_v36  ;;  %v492_v36 = vcvt.f32.s32 %v1359_v30 }
 0x1ee   : > { %v644_v39 = vadd.f32 %v632_v29, %v1237_v23  ;;  %1045 = vlog2.f32 %v610_v37  ;;  %v463_v29 = vshll.u32 %v462_v58, 16  ;;  %v679_v58 = vstv (!%p973_p9), %s670_s26 }
 0x1ef   : > { %1047 = vrcp.f32 %v610_v37  ;;  %v419_v42 = vadd.s32 %v418_v27, %v416_v38  ;;  %v1427_v33 = vpop.eup %1041  ;;  %v493_v38 = vshll.u32 %v492_v36, 16 }
 0x1f0   : > { %v1429_v61 = vsub.f32 %v644_v39, %v571_v6  ;;  %v445_v41 = vpop.xlane.xlu0 %444 }
 0x1f1   : > { %vm510_vm1 = vcmp.eq.s32.totalorder %v419_v42, %v1308_v51  ;;  %v616_v46 = vpop.xlane.xlu1 %615  ;;  %v446_v55 = vcvt.f32.s32 %v445_v41 }
 0x1f2   : > { %v1434_v57 = vsel %vm510_vm1, 1.0, %v1107_v0  ;;  %1049 = vlog2.f32 %v616_v46 }
 0x1f3   : > { %1051 = vrcp.f32 %v616_v46  ;;  %v449_v23 = vadd.s32 %v448_v45, %v446_v55  ;;  %v1436_v60 = vpop.eup %1043  ;;  %v507_v46 = vcvt.f32.s32 %v1401_v43 }
 0x1f4   : > { %v475_v62 = vpop.xlane.xlu0 %474 }
 0x1f5   : > { %vm512_vm8 = vcmp.eq.s32.totalorder %v449_v23, %v1301_v49  ;;  %v622_v40 = vpop.xlane.xlu1 %621  ;;  %v476_v63 = vcvt.f32.s32 %v475_v62 }
 0x1f6   : > { %v1440_v8 = vsel %vm512_vm8, 1.0, %v1107_v0  ;;  %1053 = vlog2.f32 %v622_v40 }
 0x1f7   : > { %1055 = vrcp.f32 %v622_v40  ;;  %v479_v51 = vadd.s32 %v478_v34, %v476_v63  ;;  %v508_v34 = vshll.u32 %v507_v46, 16 }
 0x1f8   : > { %v1046_v35 = vpop.eup %1045 }
 0x1f9   : > { %v1442_v5 = vpop.eup %1047  ;;  %v630_v44 = vmul.f32 0.6931472, %v1046_v35  ;;  %vm514_vm9 = vcmp.eq.s32.totalorder %v479_v51, %v1312_v52  ;;  %v628_v7 = vpop.xlane.xlu1 %627 }
 0x1fa   : > { %v1447_v47 = vsel %vm514_vm9, 1.0, %v1107_v0  ;;  %1057 = vrcp.f32 %v628_v7 }
 0x1fb   : > { %v643_v49 = vadd.f32 %v630_v44, %v1224_v18  ;;  %1059 = vlog2.f32 %v1416_v17 }
 0x1fc   : > { %v1050_v12 = vpop.eup %1049  ;;  %1061 = vlog2.f32 %v628_v7 }
 0x1fd   : > { %v1450_v9 = vpop.eup %1051  ;;  %v1452_v56 = vsub.f32 %v643_v49, %v568_v25  ;;  %v634_v15 = vmul.f32 0.6931472, %v1050_v12  ;;  %v430_v1 = vpop.xlane.xlu1 %429  ;;  %1063 = vlog2.f32 %v1419_v13 }
 0x1fe   : > { %v431_v52 = vcvt.f32.s32 %v430_v1 }
 0x1ff   : > { %v645_v6 = vadd.f32 %v634_v15, %v1226_v19 }
 0x200   : > { %v1054_v4 = vpop.eup %1053  ;;  %v434_v21 = vadd.s32 %v433_v20, %v431_v52 }
 0x201   : > { %v1456_v10 = vpop.eup %1055  ;;  %v1458_v22 = vsub.f32 %v645_v6, %v574_v2  ;;  %v460_v18 = vpop.xlane.xlu1 %459  ;;  %v638_v26 = vmul.f32 0.6931472, %v1054_v4 }
 0x202   : > { %vm511_vm10 = vcmp.eq.s32.totalorder %v434_v21, %v1297_v48  ;;  %v461_v25 = vcvt.f32.s32 %v460_v18 }
 0x203   : > { %v1463_v27 = vsel %vm511_vm10, 1.0, %v1107_v0  ;;  %v647_v30 = vadd.f32 %v638_v26, %v1255_v31 }
 0x204   : > { %v464_v14 = vadd.s32 %v463_v29, %v461_v25  ;;  %v1465_v37 = vpop.eup %1057 }
 0x205   : > { %v490_v19 = vpop.xlane.xlu1 %489 }
 0x206   : > { %vm513_vm11 = vcmp.eq.s32.totalorder %v464_v14, %v1305_v50  ;;  %v491_v2 = vcvt.f32.s32 %v490_v19  ;;  %v1060_v50 = vpop.eup %1059 }
 0x207   : > { %v1469_v39 = vsel %vm513_vm11, 1.0, %v1107_v0  ;;  %v1062_v3 = vpop.eup %1061  ;;  %v636_v55 = vmul.f32 0.6931472, %v1060_v50 }
 0x208   : > { %v494_v42 = vadd.s32 %v493_v38, %v491_v2  ;;  %v1064_v23 = vpop.eup %1063  ;;  %v642_v62 = vmul.f32 0.6931472, %v1062_v3 }
 0x209   : > { %v580_v48 = vpop.xlane.xlu1 %579  ;;  %v646_v63 = vadd.f32 %v636_v55, %v1239_v24  ;;  %v640_v51 = vmul.f32 0.6931472, %v1064_v23  ;;  %v672_v24 = vshrl.u32 (!%p973_p9), %v389_v16, 7 }
 0x20a   : > { %vm515_vm12 = vcmp.eq.s32.totalorder %v494_v42, %v1317_v53  ;;  %v1473_v41 = vsub.f32 %v647_v30, %v580_v48  ;;  %v649_v17 = vadd.f32 %v642_v62, %v1320_v54 }
 0x20b   : > { %v1476_v45 = vsel %vm515_vm12, 1.0, %v1107_v0  ;;  %v648_v11 = vadd.f32 %v640_v51, %v1257_v32  ;;  %v673_v54 = vadd.s32 (!%p973_p9), 8, %v672_v24  ;;  %v675_v15 = vadd.s32 (!%p973_p9), 24, %v672_v24 }
 0x20c   : > { %v676_v1 = vadd.s32 (!%p973_p9), 32, %v672_v24  ;;  %v678_v20 = vadd.s32 (!%p973_p9), 48, %v672_v24  ;;  %v680_v52 = vadd.s32 (!%p973_p9), %v679_v58, %v672_v24 }
 0x20d   : > { %v681_v6 = vadd.s32 (!%p973_p9), %v679_v58, %v673_v54  ;;  %v683_v4 = vadd.s32 (!%p973_p9), %v679_v58, %v675_v15 }
 0x20e   : > { %v684_v21 = vadd.s32 (!%p973_p9), %v679_v58, %v676_v1  ;;  %vm687_vm14 = vcmp.lt.s32.totalorder (!%p973_p9), %v680_v52, 300  ;;  %v686_v29 = vadd.s32 (!%p973_p9), %v679_v58, %v678_v20 }
 0x20f   : > { %vm688_vm15 = vcmp.lt.s32.totalorder (!%p973_p9), %v681_v6, 300  ;;  %vm690_vm2 = vcmp.lt.s32.totalorder (!%p973_p9), %v683_v4, 300  ;;  %v695_v16 = vsel (!%p973_p9), %vm687_vm14, %v1452_v56, 0.0  ;;  %v718_v26 = vsel (!%p973_p9), %vm687_vm14, %v1442_v5, 0.0 }
 0x210   : > { %vm691_vm3 = vcmp.lt.s32.totalorder (!%p973_p9), %v684_v21, 300  ;;  %v696_v36 = vsel (!%p973_p9), %vm688_vm15, %v1429_v61, 0.0  ;;  %v719_v38 = vsel (!%p973_p9), %vm688_vm15, %v1423_v28, 0.0  ;;  %vm693_vm6 = vcmp.lt.s32.totalorder (!%p973_p9), %v686_v29, 300 }
 0x211   : > { %v702_v14 = vadd.f32 (!%p973_p9), %v696_v36, %v695_v16  ;;  %v699_v42 = vsel (!%p973_p9), %vm691_vm3, %v1473_v41, 0.0  ;;  %v725_v48 = vadd.f32 (!%p973_p9), %v719_v38, %v718_v26  ;;  %v721_v50 = vsel (!%p973_p9), %vm690_vm2, %v1427_v33, 0.0 }
 0x212   : > { %v740_v3 = vsel (!%p973_p9), %vm687_vm14, %v1434_v57, 0.0  ;;  %v741_v46 = vsel (!%p973_p9), %vm688_vm15, %v1463_v27, 0.0  ;;  %v724_v20 = vsel (!%p973_p9), %vm693_vm6, %v1465_v37, 0.0 }
 0x21c   : > { %v505_v31 = vpop.xlane.xlu0 %504 }
 0x21d   : > { %v506_v53 = vcvt.f32.s32 %v505_v31 }
 0x21f   : > { %v509_v40 = vadd.s32 %v508_v34, %v506_v53  ;;  %669 = sbr.rel (%p973_p9) target bundleno = 577 (0x241), region = 36  ;;  %v743_v34 = vsel (!%p973_p9), %vm690_vm2, %v1469_v39, 0.0  ;;  %v722_v53 = vsel (!%p973_p9), %vm691_vm3, %v1456_v10, 0.0 }
 0x220   : > { %v577_v35 = vpop.xlane.xlu0 %576  ;;  %v753_v54 = vsel (!%p973_p9), %vm747_vm4, %v743_v34, 0.0  ;;  %v717_v34 = vld [vmem:[#allocation3] sm:$0x1] (!%p973_p9) }
 0x221   : > { %vm516_vm13 = vcmp.eq.s32.totalorder %v509_v40, %v1333_v59  ;;  %v1484_v13 = vsub.f32 %v646_v63, %v577_v35  ;;  %v586_v44 = vpop.xlane.xlu1 %585  ;;  %v674_v59 = vadd.s32 (!%p973_p9), 16, %v672_v24  ;;  %v748_v40 = vsel (!%p973_p9), %vm747_vm4, %v740_v3, 0.0 }
 0x222   : > { %v1487_v43 = vsel %vm516_vm13, 1.0, %v1107_v0  ;;  %v1489_v7 = vsub.f32 %v649_v17, %v586_v44  ;;  %v677_v0 = vadd.s32 (!%p973_p9), 40, %v672_v24  ;;  %v749_v63 = vsel (!%p973_p9), %vm747_vm4, %v741_v46, 0.0 }
 0x223   : > { %v682_v32 = vadd.s32 (!%p973_p9), %v679_v58, %v674_v59  ;;  %v698_v19 = vsel (!%p973_p9), %vm690_vm2, %v1484_v13, 0.0  ;;  %v744_v44 = vsel (!%p973_p9), %vm691_vm3, %v1447_v47, 0.0 }
 0x224   : > { %v583_v49 = vpop.xlane.xlu0 %582  ;;  %v685_v18 = vadd.s32 (!%p973_p9), %v679_v58, %v677_v0  ;;  %v755_v58 = vsel (!%p973_p9), %vm747_vm4, %v744_v44, 0.0 }
 0x225   : > { %v1492_v12 = vsub.f32 %v648_v11, %v583_v49  ;;  %vm689_vm0 = vcmp.lt.s32.totalorder (!%p973_p9), %v682_v32, 300  ;;  %v750_v11 = vadd.f32 (!%p973_p9), %v749_v63, %v748_v40  ;;  %v701_v49 = vsel (!%p973_p9), %vm693_vm6, %v1489_v7, 0.0 }
 0x226   : > { %v697_v25 = vsel %vm689_vm0, %v1458_v22, 0.0  ;;  %vm692_vm5 = vcmp.lt.s32.totalorder %v685_v18, 300  ;;  %v720_v2 = vsel %vm689_vm0, %v1450_v9, 0.0  ;;  %v742_v55 = vsel %vm689_vm0, %v1440_v8, 0.0 }
 0x227   : > { %v703_v30 = vadd.f32 %v702_v14, %v697_v25  ;;  %v700_v23 = vsel %vm692_vm5, %v1492_v12, 0.0  ;;  %v726_v62 = vadd.f32 %v725_v48, %v720_v2  ;;  %v751_v51 = vsel %vm747_vm4, %v742_v55, 0.0  ;;  %v694_v55 = vld [vmem:[#allocation2] sm:$0x1] }
 0x228   : > { %v723_v24 = vsel %vm692_vm5, %v1436_v60, 0.0  ;;  %v745_v1 = vsel %vm692_vm5, %v1476_v45, 0.0  ;;  %v752_v0 = vadd.f32 %v751_v51, %v750_v11  ;;  %v746_v32 = vsel %vm693_vm6, %v1487_v43, 0.0 }
 0x229   : > { %v704_v31 = vadd.f32 %v703_v30, %v698_v19  ;;  %v727_v17 = vadd.f32 %v726_v62, %v721_v50  ;;  %v757_v21 = vsel %vm747_vm4, %v745_v1, 0.0  ;;  %v759_v18 = vsel %vm747_vm4, %v746_v32, 0.0 }
 0x22a   : > { %v754_v4 = vadd.f32 %v753_v54, %v752_v0 }
 0x22b   : > { %v705_v35 = vadd.f32 %v704_v31, %v699_v42  ;;  %v728_v15 = vadd.f32 %v727_v17, %v722_v53  ;;  %v739_v17 = vld [vmem:[#allocation4] sm:$0x1] }
 0x22c   : > { %v756_v25 = vadd.f32 %v755_v58, %v754_v4 }
 0x22d   : > { %v706_v59 = vadd.f32 %v705_v35, %v700_v23  ;;  %v729_v6 = vadd.f32 %v728_v15, %v723_v24 }
 0x22e   : > { %v758_v19 = vadd.f32 %v757_v21, %v756_v25 }
 0x22f   : > { %v707_v52 = vadd.f32 %v706_v59, %v701_v49  ;;  %v730_v36 = vadd.f32 %v729_v6, %v724_v20 }
 0x230   : > { %v760_v42 = vadd.f32 %v759_v18, %v758_v19 }
 0x231   : > { %v708_v16 = vrot.slane %v707_v52, 4  ;;  %v731_v26 = vrot.slane %v730_v36, 4 }
 0x232   : > { %v761_v50 = vrot.slane %v760_v42, 4 }
 0x233   : > { %v709_v14 = vadd.f32 %v708_v16, %v707_v52  ;;  %v732_v2 = vadd.f32 %v731_v26, %v730_v36 }
 0x234   : > { %v762_v46 = vadd.f32 %v761_v50, %v760_v42 }
 0x235   : > { %v710_v38 = vrot.slane %v709_v14, 2  ;;  %v733_v48 = vrot.slane %v732_v2, 2 }
 0x236   : > { %v763_v62 = vrot.slane %v762_v46, 2 }
 0x237   : > { %v711_v30 = vadd.f32 %v710_v38, %v709_v14  ;;  %v734_v29 = vadd.f32 %v733_v48, %v732_v2 }
 0x238   : > { %v764_v63 = vadd.f32 %v763_v62, %v762_v46 }
 0x239   : > { %v712_v3 = vrot.slane %v711_v30, 1  ;;  %v735_v31 = vrot.slane %v734_v29, 1 }
 0x23a   : > { %v765_v35 = vrot.slane %v764_v63, 1 }
 0x23b   : > { %v713_v23 = vadd.f32 %v712_v3, %v711_v30  ;;  %v736_v40 = vadd.f32 %v735_v31, %v734_v29 }
 0x23c   : > { %v766_v44 = vadd.f32 %v765_v35, %v764_v63 }
 0x23d   : > { %v714_v53 = vadd.f32 %v713_v23, %v694_v55  ;;  %v737_v51 = vadd.f32 %v736_v40, %v717_v34 }
 0x23e   : > { %v767_v11 = vadd.f32 %v766_v44, %v739_v17 }
 0x23f   : > { %716 = vst.msk [vmem:[#allocation2] sm:$0x1] %vm715_vm7, %v714_v53  ;;  %738 = vst.msk [vmem:[#allocation3] sm:$0x1] %vm715_vm7, %v737_v51 }
 0x240   : > { %768 = vst.msk [vmem:[#allocation4] sm:$0x1] %vm715_vm7, %v767_v11 }
 0x241 PF: > { %p974_p10 = scmp.gt.s32.totalorder %s1414_s25, 300 }
 0x242   : > { %v774_v49 = vadd.f32 (!%p974_p10), %v1429_v61, %v1452_v56  ;;  %v790_v24 = vadd.f32 (!%p974_p10), %v1442_v5, %v1423_v28  ;;  %vm805_vm1 = vcmask (!%p974_p10), 7168   ;;  %vm787_vm8 = vcmask (!%p974_p10), 0  }
 0x243   : > { %772 = sbr.rel (%p974_p10) target bundleno = 607 (0x25f), region = 40  ;;  %v806_v54 = vsel (!%p974_p10), %vm805_vm1, %v1434_v57, 0.0  ;;  %v807_v59 = vsel (!%p974_p10), %vm805_vm1, %v1463_v27, 0.0  ;;  %v809_v15 = vsel (!%p974_p10), %vm805_vm1, %v1440_v8, 0.0  ;;  %v811_v61 = vsel (!%p974_p10), %vm805_vm1, %v1469_v39, 0.0 }
 0x244   : > { %v775_v1 = vadd.f32 (!%p974_p10), %v774_v49, %v1458_v22  ;;  %v791_v0 = vadd.f32 (!%p974_p10), %v1450_v9, %v790_v24  ;;  %v808_v20 = vadd.f32 (!%p974_p10), %v807_v59, %v806_v54  ;;  %v813_v57 = vsel (!%p974_p10), %vm805_vm1, %v1447_v47, 0.0 }
 0x245   : > { %v815_v9 = vsel (!%p974_p10), %vm805_vm1, %v1476_v45, 0.0 }
 0x246   : > { %v776_v28 = vadd.f32 (!%p974_p10), %v775_v1, %v1484_v13  ;;  %v792_v5 = vadd.f32 (!%p974_p10), %v1427_v33, %v791_v0  ;;  %v810_v56 = vadd.f32 (!%p974_p10), %v809_v15, %v808_v20  ;;  %v817_v33 = vsel (!%p974_p10), %vm805_vm1, %v1487_v43, 0.0  ;;  %v773_v19 = vld [vmem:[#allocation2] sm:$0x1] (!%p974_p10) }
 0x247   : > { %v804_v42 = vld [vmem:[#allocation4] sm:$0x1] (!%p974_p10) }
 0x248   : > { %v777_v27 = vadd.f32 (!%p974_p10), %v776_v28, %v1473_v41  ;;  %v793_v8 = vadd.f32 (!%p974_p10), %v1456_v10, %v792_v5  ;;  %v812_v58 = vadd.f32 (!%p974_p10), %v811_v61, %v810_v56 }
 0x24a   : > { %v778_v22 = vadd.f32 %v777_v27, %v1492_v12  ;;  %v794_v39 = vadd.f32 %v1436_v60, %v793_v8  ;;  %v814_v52 = vadd.f32 %v813_v57, %v812_v58 }
 0x24c   : > { %v779_v13 = vadd.f32 %v778_v22, %v1489_v7  ;;  %v795_v47 = vadd.f32 %v1465_v37, %v794_v39  ;;  %v816_v6 = vadd.f32 %v815_v9, %v814_v52  ;;  %v789_v7 = vld [vmem:[#allocation3] sm:$0x1] }
 0x24e   : > { %v780_v41 = vrot.slane %v779_v13, 4  ;;  %v796_v32 = vrot.slane %v795_v47, 4  ;;  %v818_v10 = vadd.f32 %v817_v33, %v816_v6 }
 0x250   : > { %v781_v4 = vadd.f32 %v780_v41, %v779_v13  ;;  %v797_v21 = vadd.f32 %v796_v32, %v795_v47  ;;  %v819_v16 = vrot.slane %v818_v10, 4 }
 0x252   : > { %v782_v45 = vrot.slane %v781_v4, 2  ;;  %v798_v36 = vrot.slane %v797_v21, 2  ;;  %v820_v12 = vadd.f32 %v819_v16, %v818_v10 }
 0x254   : > { %v783_v25 = vadd.f32 %v782_v45, %v781_v4  ;;  %v799_v60 = vadd.f32 %v798_v36, %v797_v21  ;;  %v821_v18 = vrot.slane %v820_v12, 2 }
 0x256   : > { %v784_v14 = vrot.slane %v783_v25, 1  ;;  %v800_v26 = vrot.slane %v799_v60, 1  ;;  %v822_v43 = vadd.f32 %v821_v18, %v820_v12 }
 0x258   : > { %v785_v38 = vadd.f32 %v784_v14, %v783_v25  ;;  %v801_v37 = vadd.f32 %v800_v26, %v799_v60  ;;  %v823_v2 = vrot.slane %v822_v43, 1 }
 0x25a   : > { %v786_v30 = vadd.f32 %v785_v38, %v773_v19  ;;  %v802_v48 = vadd.f32 %v801_v37, %v789_v7  ;;  %v824_v50 = vadd.f32 %v823_v2, %v822_v43 }
 0x25c   : > { %788 = vst.msk [vmem:[#allocation2] sm:$0x1] %vm787_vm8, %v786_v30  ;;  %803 = vst.msk [vmem:[#allocation3] sm:$0x1] %vm787_vm8, %v802_v48  ;;  %v825_v3 = vadd.f32 %v824_v50, %v804_v42 }
 0x25e   : > { %826 = vst.msk [vmem:[#allocation4] sm:$0x1] %vm787_vm8, %v825_v3 }
 0x25f PF: > { %p975_p11 = scmp.ne.s32.totalorder %s1087_s15, 2 }
 0x260   : > { %vm832_vm9 = vcmask (!%p975_p11), 0  }
 0x261   : > { %830 = sbr.rel (%p975_p11) target bundleno = 616 (0x268), region = 44 }
 0x263   : > { %v831_v29 = vld [vmem:[#allocation2] sm:$0x1] (!%p975_p11)  ;;  %v834_v46 = vld [vmem:[#allocation3] sm:$0x1] (!%p975_p11) }
 0x264   : > { %833 = vst.msk [vmem:[%s336_s27] sm:$0x1] (!%p975_p11), %vm832_vm9, %v831_v29  ;;  %835 = vst.msk [vmem:[%s339_s30] sm:$0x1] (!%p975_p11), %vm832_vm9, %v834_v46 }
 0x265   : > { %v836_v55 = vld [vmem:[#allocation4] sm:$0x1] (!%p975_p11) }
 0x266   : > { %837 = vst.msk [vmem:[%s342_s8] sm:$0x1] (!%p975_p11), %vm832_vm9, %v836_v55 }
 0x268 PF: > { %s15_s19 = sadd.s32 1, %s1103_s19   ;;  %s1611_s15 = smov %s1095_s17 }
 0x269   : > { %p12_p12 = scmp.ge.s32.totalorder %s15_s19, 8   ;;  %s1612_s16 = smov %s1099_s18 }
 0x26a   : > { %s1613_s17 = smov %s1616_s20  ;;  %s1614_s18 = smov %s1620_s21 }
 0x26b   :  { %14 = sbr.rel (!%p12_p12) target bundleno = 3 (0x3), region = 101 }

</bundles_post_ra>
